<compile_context>
chip_gen: v5e
topology: v5e:2x2
jax: 0.10.0
libtpu: 0.0.40
codegen_flags: <defaults>
</compile_context>

<pallas_src>
import functools

import jax
import jax.numpy as jnp
from jax.experimental import pallas as pl
from jax.experimental.pallas import tpu as pltpu

LANES = 128
_MIB = 1024 * 1024


def _tpu_budget():
    """Generation-aware (target_block_bytes, vmem_limit_bytes)."""
    try:
        cap = pltpu.get_tpu_info().vmem_capacity_bytes
    except Exception:  # noqa: BLE001 - be robust if the probe is unavailable
        cap = None
    if cap is not None and cap >= 96 * _MIB:       # v5e / v6e: 128 MiB VMEM
        return 4 * _MIB, 64 * _MIB
    # v7x (64 MiB VMEM) or unknown hardware: stay conservative.
    return 2 * _MIB, 48 * _MIB


def _choose_layout(shape, total, itemsize):
    """Pick a zero-copy 2D (R, C) view when possible.

    Returns (R, C, needs_pad). needs_pad=True means one lane-padding copy is
    unavoidable (narrow trailing dim, lane-ragged total).
    """
    if total % LANES == 0:
        return total // LANES, LANES, False                   # free flat view
    if len(shape) >= 2:
        c = int(shape[-1])
        r = total // c
        padded_c = pl.cdiv(c, LANES) * LANES
        # Native last-dim tiling: zero copies; require >=50% lane utilization
        # and a sane row width so VMEM blocks stay reasonable.
        if r >= 8 and 2 * c >= padded_c and padded_c * itemsize <= 16384:
            return r, c, False
    # TODO(synk): truly zero-copy handling of lane-ragged narrow tensors (e.g.
    # (N,4) bboxes with N % 32 != 0) needs 1-D refs or manual DMA; fall back to
    # a single pad copy for that case.
    return pl.cdiv(total, LANES), LANES, True


def _choose_block_rows(rows, cols, itemsize, target_block_bytes, max_rows=None):
    padded_c = pl.cdiv(cols, LANES) * LANES
    row_bytes = padded_c * itemsize
    tile_rows = max(32, (target_block_bytes // row_bytes) // 32 * 32)
    if max_rows is not None:                                   # test hook
        tile_rows = max(32, min(tile_rows, (int(max_rows) // 32) * 32))
    # Full extent when it fits (always legal); otherwise a multiple of 32 so the
    # (8/16/32, 128) sublane-tiling constraint holds for every dtype.
    return rows if rows <= tile_rows else tile_rows


# ----------------------------------------------------------------------------
# Kernels
# ----------------------------------------------------------------------------
def _l1_elemwise_kernel(loss_weight, with_weight, *refs):
    if with_weight:
        p_ref, t_ref, w_ref, o_ref = refs
    else:
        p_ref, t_ref, o_ref = refs
        w_ref = None
    p = p_ref[...]
    d = jnp.abs(p - t_ref[...].astype(p.dtype))          # native-dtype compute
    if with_weight:
        d = d * w_ref[...].astype(d.dtype)
    if loss_weight != 1.0:
        d = d * jnp.asarray(loss_weight, dtype=d.dtype)
    o_ref[...] = d.astype(o_ref.dtype)


def _l1_sum_kernel(n_blocks, n_inner, has_overhang, valid_rows, block_rows,
                   acc_rows, with_weight, scale, *refs):
    if with_weight:
        p_ref, t_ref, w_ref, o_ref, acc_ref = refs
    else:
        p_ref, t_ref, o_ref, acc_ref = refs
        w_ref = None

    part = pl.program_id(0)
    i = pl.program_id(1)
    blk = part * n_inner + i
    last_blk = n_blocks - 1

    @pl.when(i == 0)
    def _():
        acc_ref[...] = jnp.zeros_like(acc_ref)

    d = jnp.abs(p_ref[...].astype(jnp.float32) - t_ref[...].astype(jnp.float32))
    if with_weight:
        d = d * w_ref[...].astype(jnp.float32)

    def accumulate(x):
        # Pre-reduce in-register (pure VPU adds) so the scratch accumulator is
        # a single (8, C) slab instead of a full block.
        if acc_rows != block_rows:
            x = jnp.sum(x.reshape(block_rows // acc_rows, acc_rows, x.shape[-1]),
                        axis=0)
        acc_ref[...] += x

    ragged = (valid_rows % block_rows) != 0
    if ragged:
        # Only the single boundary block pays for the mask; the `<` comparison
        # also skips any overhang step (blk > last_blk) from the odd split.
        @pl.when(blk < last_blk)
        def _():
            accumulate(d)

        @pl.when(blk == last_blk)
        def _():
            rows_in_last = valid_rows - last_blk * block_rows
            rid = jax.lax.broadcasted_iota(jnp.int32, d.shape, 0)
            accumulate(jnp.where(rid < rows_in_last, d, 0.0))
    elif has_overhang:
        @pl.when(blk <= last_blk)
        def _():
            accumulate(d)
    else:
        accumulate(d)

    @pl.when(i == n_inner - 1)
    def _():
        # Single cross-sublane reduce per partial; loss_weight / mean
        # denominator folded in here (feedback: fuse the epilogue).
        r = jnp.sum(acc_ref[...], axis=0, keepdims=True)
        if scale != 1.0:
            r = r * jnp.float32(scale)
        o_ref[...] = r[None, :, :]


# ----------------------------------------------------------------------------
# Wrapper
# ----------------------------------------------------------------------------
def l1_loss_pallas(pred, target, weight=None, reduction='mean',
                   avg_factor=None, loss_weight=1.0, _max_block_rows=None):
    assert pred.shape == target.shape and pred.size > 0
    assert reduction in ('none', 'mean', 'sum')
    if weight is not None:
        assert weight.shape == pred.shape
    if avg_factor is not None and reduction == 'sum':
        raise ValueError('avg_factor can not be used with reduction="sum"')

    total = int(pred.size)
    itemsize = jnp.dtype(pred.dtype).itemsize
    target_block_bytes, vmem_limit = _tpu_budget()
    R, C, needs_pad = _choose_layout(pred.shape, total, itemsize)
    block_rows = _choose_block_rows(R, C, itemsize, target_block_bytes,
                                    _max_block_rows)
    n_blocks = pl.cdiv(R, block_rows)
    with_weight = weight is not None

    def to2d(x):
        if not needs_pad:
            return x.reshape(R, C)                       # free view, no copy
        flat = jnp.ravel(x)
        flat = jnp.pad(flat, (0, R * LANES - total))     # rare fallback copy
        return flat.reshape(R, LANES)

    inputs = [to2d(pred), to2d(target)]
    if with_weight:
        inputs.append(to2d(weight))

    # ---------------- 'none': elementwise ----------------
    if reduction == 'none':
        tile = pl.BlockSpec((block_rows, C), lambda i: (i, 0))
        out = pl.pallas_call(
            functools.partial(_l1_elemwise_kernel, float(loss_weight),
                              with_weight),
            out_shape=jax.ShapeDtypeStruct((R, C), pred.dtype),
            grid_spec=pltpu.PrefetchScalarGridSpec(
                num_scalar_prefetch=0,
                grid=(n_blocks,),
                in_specs=[tile] * len(inputs),
                out_specs=tile),
            compiler_params=pltpu.CompilerParams(
                dimension_semantics=("parallel",),
                vmem_limit_bytes=vmem_limit),
        )(*inputs)
        if needs_pad:
            return out.reshape(-1)[:total].reshape(pred.shape)
        return out.reshape(pred.shape)

    # ---------------- 'mean' / 'sum': in-kernel partial reduction -----------
    scale = float(loss_weight)
    if reduction == 'mean' and avg_factor is None:
        scale = scale / float(total)

    n_partials = 2 if n_blocks >= 2 else 1          # feeds both v7x TensorCores
    n_inner = pl.cdiv(n_blocks, n_partials)
    has_overhang = n_partials * n_inner > n_blocks
    acc_rows = 8 if (block_rows % 8 == 0 and C % LANES == 0) else block_rows
    last_blk = n_blocks - 1

    def in_map(p, i):
        # Overhang step (odd n_blocks) re-reads the last valid block; the
        # kernel skips accumulating it.
        return (jnp.minimum(p * n_inner + i, last_blk), 0)

    tile = pl.BlockSpec((block_rows, C), in_map)
    partials = pl.pallas_call(
        functools.partial(_l1_sum_kernel, n_blocks, n_inner, has_overhang,
                          R, block_rows, acc_rows, with_weight, scale),
        out_shape=jax.ShapeDtypeStruct((n_partials, 1, C), jnp.float32),
        grid_spec=pltpu.PrefetchScalarGridSpec(
            num_scalar_prefetch=0,
            grid=(n_partials, n_inner),
            in_specs=[tile] * len(inputs),
            out_specs=pl.BlockSpec((1, 1, C), lambda p, i: (p, 0, 0)),
            scratch_shapes=[pltpu.VMEM((acc_rows, C), jnp.float32)]),
        compiler_params=pltpu.CompilerParams(
            dimension_semantics=("parallel", "arbitrary"),
            vmem_limit_bytes=vmem_limit),
    )(*inputs)

    loss = jnp.sum(partials)               # tiny; scale already applied in-kernel
    if avg_factor is not None:             # reduction == 'mean'
        loss = loss / avg_factor
    return loss.astype(pred.dtype)


class L1Loss:
    """JAX/Pallas port of mmdet L1Loss (no learnable parameters)."""

    def __init__(self, reduction='mean', loss_weight=1.0):
        self.reduction = reduction
        self.loss_weight = loss_weight

    def __call__(self, pred, target, weight=None, avg_factor=None,
                 reduction_override=None, **kwargs):
        assert reduction_override in (None, 'none', 'mean', 'sum')
        reduction = reduction_override if reduction_override else self.reduction
        return l1_loss_pallas(pred, target, weight=weight, reduction=reduction,
                              avg_factor=avg_factor,
                              loss_weight=self.loss_weight, **kwargs)


# ----------------------------------------------------------------------------
# Self-test
# ----------------------------------------------------------------------------
def _reference(pred, target, weight, reduction, avg_factor, loss_weight):
    loss = jnp.abs(pred - target)
    if weight is not None:
        loss = loss * weight
    if reduction == 'none':
        return loss_weight * loss
    if avg_factor is None:
        red = jnp.mean(loss) if reduction == 'mean' else jnp.sum(loss)
    else:
        red = jnp.sum(loss) / avg_factor
    return loss_weight * red


if __name__ == "__main__":
    key = jax.random.PRNGKey(0)

    def check(case_key, shape, use_weight, dtype=jnp.float32, max_rows=None,
              rtol=1e-4, atol=1e-3):
        k1, k2, k3 = jax.random.split(case_key, 3)
        pred = jax.random.normal(k1, shape, dtype=jnp.float32).astype(dtype)
        target = jax.random.normal(k2, shape, dtype=jnp.float32).astype(dtype)
        weight = ((jax.random.uniform(k3, shape) > 0.3).astype(dtype)
                  if use_weight else None)

        out_mean = l1_loss_pallas(pred, target, weight, 'mean', None, 2.0,
                                  _max_block_rows=max_rows)
        out_sum = l1_loss_pallas(pred, target, weight, 'sum', None, 2.0,
                                 _max_block_rows=max_rows)
        out_none = l1_loss_pallas(pred, target, weight, 'none', None, 2.0,
                                  _max_block_rows=max_rows)
        out_avgf = l1_loss_pallas(pred, target, weight, 'mean', 123.0, 2.0,
                                  _max_block_rows=max_rows)
        jax.block_until_ready((out_mean, out_sum, out_none, out_avgf))

        p32, t32 = pred.astype(jnp.float32), target.astype(jnp.float32)
        w32 = None if weight is None else weight.astype(jnp.float32)
        ref_mean = _reference(p32, t32, w32, 'mean', None, 2.0)
        ref_sum = _reference(p32, t32, w32, 'sum', None, 2.0)
        ref_none = _reference(p32, t32, w32, 'none', None, 2.0)
        ref_avgf = _reference(p32, t32, w32, 'mean', 123.0, 2.0)

        assert out_none.shape == pred.shape and out_none.dtype == pred.dtype
        assert jnp.allclose(out_mean.astype(jnp.float32), ref_mean,
                            rtol=rtol, atol=atol)
        assert jnp.allclose(out_sum.astype(jnp.float32), ref_sum,
                            rtol=rtol, atol=atol * 100)
        assert jnp.allclose(out_none.astype(jnp.float32), ref_none,
                            rtol=rtol, atol=atol)
        assert jnp.allclose(out_avgf.astype(jnp.float32), ref_avgf,
                            rtol=rtol, atol=atol)

    keys = jax.random.split(key, 7)
    # lane-aligned (total % 128 == 0), single block, weighted / unweighted
    check(keys[0], (2, 4, 16, 16), True)
    check(keys[1], (2, 4, 16, 16), False)
    # total % 128 != 0: zero-copy native last-dim tiling (no pad, no out slice)
    check(keys[2], (3, 4, 100, 100), True)
    check(keys[3], (3, 4, 100, 250), False)
    # forced small blocks: multi-block grid, 2-way partials with an overhang
    # step and a ragged boundary-row mask
    check(keys[4], (3, 4, 100, 250), True, max_rows=64)
    check(keys[5], (8, 4, 32, 32), False, max_rows=96)
    # narrow trailing dim -> padded-lane fallback path
    check(keys[6], (37, 4), True)
    # bf16 smoke test (native-dtype elementwise compute)
    check(keys[0], (2, 4, 16, 16), True, dtype=jnp.bfloat16, rtol=2e-2, atol=2e-2)

    # class-style usage mirroring the PyTorch module
    mod = L1Loss(reduction='mean', loss_weight=2.0)
    p = jax.random.normal(keys[1], (2, 4, 16, 16), dtype=jnp.float32)
    t = jax.random.normal(keys[2], (2, 4, 16, 16), dtype=jnp.float32)
    res = mod(p, t, reduction_override='sum')
    jax.block_until_ready(res)
    assert jnp.allclose(res, _reference(p, t, None, 'sum', None, 2.0),
                        rtol=1e-4, atol=1e-1)

    print("KERNEL_OK")
</pallas_src>

<mosaic_0001>
module attributes {stable_mosaic.version = 11 : i64} {
  func.func @_l1_sum_kernel(%arg0: i32, %arg1: i32, %arg2: memref<16x128xf32, #tpu.memory_space<vmem>>, %arg3: memref<16x128xf32, #tpu.memory_space<vmem>>, %arg4: memref<16x128xf32, #tpu.memory_space<vmem>>, %arg5: memref<1x1x128xf32, #tpu.memory_space<vmem>>, %arg6: memref<8x128xf32, #tpu.memory_space<vmem>>) attributes {dimension_semantics = [#tpu.dimension_semantics<parallel>, #tpu.dimension_semantics<arbitrary>], iteration_bounds = array<i64: 1, 1>, scalar_prefetch = 0 : i64, scratch_operands = 1 : i64, tpu.core_type = #tpu.core_type<tc>, window_params = [{transform_indices = @transform_0, window_bounds = array<i64: 16, 128>}, {transform_indices = @transform_1, window_bounds = array<i64: 16, 128>}, {transform_indices = @transform_2, window_bounds = array<i64: 16, 128>}, {transform_indices = @transform_3, window_bounds = array<i64: 1, 1, 128>}]} {
    %c0_i32 = arith.constant 0 : i32
    %0 = arith.cmpi eq, %arg1, %c0_i32 : i32
    %1 = arith.extui %0 : i1 to i32
    %c0_i32_0 = arith.constant 0 : i32
    %2 = arith.cmpi ne, %1, %c0_i32_0 : i32
    scf.if %2 {
      %cst_12 = arith.constant 0.000000e+00 : f32
      %17 = vector.broadcast %cst_12 : f32 to vector<8x128xf32>
      %c0_13 = arith.constant 0 : index
      %c0_14 = arith.constant 0 : index
      %18 = vector.load %arg6[%c0_13, %c0_14] : memref<8x128xf32, #tpu.memory_space<vmem>>, vector<8x128xf32>
      tpu.vector_store %arg6[%c0_13, %c0_14], %17 {strides = array<i32>} : memref<8x128xf32, #tpu.memory_space<vmem>>, vector<8x128xf32>,
    } else {
    }
    %c0 = arith.constant 0 : index
    %c0_1 = arith.constant 0 : index
    %3 = vector.load %arg2[%c0, %c0_1] : memref<16x128xf32, #tpu.memory_space<vmem>>, vector<16x128xf32>
    %c0_2 = arith.constant 0 : index
    %c0_3 = arith.constant 0 : index
    %4 = vector.load %arg3[%c0_2, %c0_3] : memref<16x128xf32, #tpu.memory_space<vmem>>, vector<16x128xf32>
    %5 = arith.subf %3, %4 : vector<16x128xf32>
    %6 = math.absf %5 : vector<16x128xf32>
    %c0_4 = arith.constant 0 : index
    %c0_5 = arith.constant 0 : index
    %7 = vector.load %arg4[%c0_4, %c0_5] : memref<16x128xf32, #tpu.memory_space<vmem>>, vector<16x128xf32>
    %8 = arith.mulf %6, %7 : vector<16x128xf32>
    %9 = vector.shape_cast %8 : vector<16x128xf32> to vector<2x8x128xf32>
    %cst = arith.constant dense<0.000000e+00> : vector<8x128xf32>
    %10 = vector.multi_reduction <add>, %9, %cst [0] : vector<2x8x128xf32> to vector<8x128xf32>
    %c0_6 = arith.constant 0 : index
    %c0_7 = arith.constant 0 : index
    %11 = vector.load %arg6[%c0_6, %c0_7] : memref<8x128xf32, #tpu.memory_space<vmem>>, vector<8x128xf32>
    %12 = arith.addf %11, %10 : vector<8x128xf32>
    %c0_8 = arith.constant 0 : index
    %c0_9 = arith.constant 0 : index
    %13 = vector.load %arg6[%c0_8, %c0_9] : memref<8x128xf32, #tpu.memory_space<vmem>>, vector<8x128xf32>
    tpu.vector_store %arg6[%c0_8, %c0_9], %12 {strides = array<i32>} : memref<8x128xf32, #tpu.memory_space<vmem>>, vector<8x128xf32>,
    %c0_i32_10 = arith.constant 0 : i32
    %14 = arith.cmpi eq, %arg1, %c0_i32_10 : i32
    %15 = arith.extui %14 : i1 to i32
    %c0_i32_11 = arith.constant 0 : i32
    %16 = arith.cmpi ne, %15, %c0_i32_11 : i32
    scf.if %16 {
      %c0_12 = arith.constant 0 : index
      %c0_13 = arith.constant 0 : index
      %17 = vector.load %arg6[%c0_12, %c0_13] : memref<8x128xf32, #tpu.memory_space<vmem>>, vector<8x128xf32>
      %cst_14 = arith.constant dense<0.000000e+00> : vector<128xf32>
      %18 = vector.multi_reduction <add>, %17, %cst_14 [0] : vector<8x128xf32> to vector<128xf32>
      %19 = vector.shape_cast %18 : vector<128xf32> to vector<1x128xf32>
      %cst_15 = arith.constant 9.765625E-4 : f32
      %20 = vector.broadcast %cst_15 : f32 to vector<1x128xf32>
      %21 = arith.mulf %19, %20 : vector<1x128xf32>
      %22 = vector.shape_cast %21 : vector<1x128xf32> to vector<1x1x128xf32>
      %c0_16 = arith.constant 0 : index
      %c0_17 = arith.constant 0 : index
      %c0_18 = arith.constant 0 : index
      %23 = vector.load %arg5[%c0_16, %c0_17, %c0_18] : memref<1x1x128xf32, #tpu.memory_space<vmem>>, vector<1x1x128xf32>
      tpu.vector_store %arg5[%c0_16, %c0_17, %c0_18], %22 {strides = array<i32>} : memref<1x1x128xf32, #tpu.memory_space<vmem>>, vector<1x1x128xf32>,
    } else {
    }
    return
  }
  func.func @transform_0(%arg0: i32, %arg1: i32) -> (i32, i32) {
    %c1_i32 = arith.constant 1 : i32
    %0 = arith.muli %arg0, %c1_i32 : i32
    %1 = arith.addi %0, %arg1 : i32
    %c0_i32 = arith.constant 0 : i32
    %2 = arith.minsi %1, %c0_i32 : i32
    %c0_i32_0 = arith.constant 0 : i32
    %c0_i32_1 = arith.constant 0 : i32
    return %2, %c0_i32_0 : i32, i32
  }
  func.func @transform_1(%arg0: i32, %arg1: i32) -> (i32, i32) {
    %c1_i32 = arith.constant 1 : i32
    %0 = arith.muli %arg0, %c1_i32 : i32
    %1 = arith.addi %0, %arg1 : i32
    %c0_i32 = arith.constant 0 : i32
    %2 = arith.minsi %1, %c0_i32 : i32
    %c0_i32_0 = arith.constant 0 : i32
    %c0_i32_1 = arith.constant 0 : i32
    return %2, %c0_i32_0 : i32, i32
  }
  func.func @transform_2(%arg0: i32, %arg1: i32) -> (i32, i32) {
    %c1_i32 = arith.constant 1 : i32
    %0 = arith.muli %arg0, %c1_i32 : i32
    %1 = arith.addi %0, %arg1 : i32
    %c0_i32 = arith.constant 0 : i32
    %2 = arith.minsi %1, %c0_i32 : i32
    %c0_i32_0 = arith.constant 0 : i32
    %c0_i32_1 = arith.constant 0 : i32
    return %2, %c0_i32_0 : i32, i32
  }
  func.func @transform_3(%arg0: i32, %arg1: i32) -> (i32, i32, i32) {
    %c0_i32 = arith.constant 0 : i32
    %c0_i32_0 = arith.constant 0 : i32
    %c0_i32_1 = arith.constant 0 : i32
    return %arg0, %c0_i32, %c0_i32_0 : i32, i32, i32
  }
}

</mosaic_0001>

<bundles_post_ra>
// kernel: tpu_custom_call.1
= control target key start
LH: loop header
LB: loop body
LE: loop exit
PB: predicated region body
PF: predicated region fallthrough
CT: control target
= control target key end

     0   :  { %8 = vsyncpa [#allocation4], 0  ;;  %s295_s0 = inlined_call_operand.hbm [shape: f32[16,128], index: 0, kind: input, shape index: {}]   ;;  %s296_s1 = inlined_call_operand.hbm [shape: f32[16,128], index: 1, kind: input, shape index: {}]   ;;  %s297_s2 = inlined_call_operand.hbm [shape: f32[16,128], index: 2, kind: input, shape index: {}]   ;;  %s298_s3 = inlined_call_operand.hbm [shape: f32[1,1,128], index: 3, kind: output, shape index: {}]  }
   0x1   :  { %9 = vsyncpa [#allocation7], 0 }
   0x2   :  { %10 = vsyncpa [#allocation5], 0  ;;  %s40_s14 = sshll.u32 %s296_s1, 4  ;;  %s257_s15 = smov [#allocation6]   ;;  %s41_s14 = int_to_ptr.hbm [resolvable:$true] %s40_s14 }
   0x3   :  { %s42_s16 = sshll.u32 %s257_s15, 4  ;;  %s21_s19 = sshll.u32 %s295_s0, 4  ;;  %s43_s16 = int_to_ptr.vmem [resolvable:$true] %s42_s16  ;;  %s22_s19 = int_to_ptr.hbm [resolvable:$true] %s21_s19 }
   0x4   :  { %s258_s20 = smov 128   ;;  %s259_s21 = smov 8  }
   0x5   :  { %48 = dma.hbm_to_vmem [thread:$0]  %s41_s14, 256, %s43_s16, [#allocation7], %s258_s20, %s258_s20, %s259_s21  }
   0x6   :  { %s260_s22 = smov [#allocation3]   ;;  %s59_s26 = sshll.u32 %s297_s2, 4  ;;  %s60_s26 = int_to_ptr.hbm [resolvable:$true] %s59_s26 }
   0x7   :  { %s23_s23 = sshll.u32 %s260_s22, 4  ;;  %s261_s1 = smov [#allocation8]   ;;  %s24_s23 = int_to_ptr.vmem [resolvable:$true] %s23_s23 }
   0x8   :  { %29 = dma.hbm_to_vmem [thread:$0]  %s22_s19, 256, %s24_s23, [#allocation4], %s258_s20, %s258_s20, %s259_s21  }
   0x9   :  { %s61_s27 = sshll.u32 %s261_s1, 4  ;;  %s62_s27 = int_to_ptr.vmem [resolvable:$true] %s61_s27 }
   0xa   :  { %67 = dma.hbm_to_vmem [thread:$0]  %s60_s26, 256, %s62_s27, [#allocation7], %s258_s20, %s258_s20, %s259_s21  }
   0xb   :  { %251 = dma.done.wait [#allocation4], 256  }
   0xc   :  { %252 = vsyncadd [#allocation4], 4294967040 }
   0xd   :  { %253 = dma.done.wait [#allocation7], 512  }
   0xe   :  { %254 = vsyncadd [#allocation7], 4294966784  ;;  %v97_v0 = vld [vmem:[#allocation3] sm:$0xff]  ;;  %v98_v1 = vld [vmem:[#allocation3 + $0x8] sm:$0xff]  ;;  %s262_s0 = smov [#allocation9]   ;;  %s132_s30 = sshll.u32 %s298_s3, 4  ;;  %s133_s30 = int_to_ptr.hbm [resolvable:$true] %s132_s30 }
   0xf   :  { %v99_v2 = vld [vmem:[#allocation6] sm:$0xff]  ;;  %v100_v3 = vld [vmem:[#allocation6 + $0x8] sm:$0xff]  ;;  %v105_v6 = vld [vmem:[#allocation8] sm:$0xff]  ;;  %s130_s2 = sshll.u32 %s262_s0, 4  ;;  %s131_s2 = int_to_ptr.vmem [resolvable:$true] %s130_s2 }
  0x10   :  { %v101_v4 = vsub.f32 %v97_v0, %v99_v2  ;;  %v102_v5 = vsub.f32 %v98_v1, %v100_v3  ;;  %v106_v8 = vld [vmem:[#allocation8 + $0x8] sm:$0xff] }
  0x12   :  { %v103_v7 = vand.u32 2147483647, %v101_v4  ;;  %v104_v9 = vand.u32 2147483647, %v102_v5 }
  0x14   :  { %v107_v10 = vmul.f32 %v105_v6, %v103_v7  ;;  %v108_v11 = vmul.f32 %v106_v8, %v104_v9 }
  0x16   :  { %v109_v12 = vadd.f32 %v108_v11, %v107_v10 }
  0x18   :  { %v117_v13 = vrot.slane %v109_v12, 4 }
  0x1a   :  { %v118_v14 = vadd.f32 %v117_v13, %v109_v12 }
  0x1c   :  { %v119_v15 = vrot.slane %v118_v14, 2 }
  0x1e   :  { %v120_v16 = vadd.f32 %v119_v15, %v118_v14 }
  0x20   :  { %v121_v17 = vrot.slane %v120_v16, 1 }
  0x22   :  { %v122_v18 = vadd.f32 %v121_v17, %v120_v16 }
  0x24   :  { %v123_v19 = vmul.f32 0.0009765625, %v122_v18 }
  0x26   :  { %124 = vst [vmem:[#allocation9] sm:$0x1] %v123_v19 }
  0x27   :  { %135 = dma.vmem_to_hbm [thread:$0]  %s131_s2, 16, %s133_s30, [#allocation5]  }
  0x28   :  { %255 = dma.done.wait [#allocation5], 16  }
  0x29   :  { %256 = vsyncadd [#allocation5], 4294967280 }
  0x2a   :  { %140 = vsyncpa [#allocation4], 1 }
  0x2b   :  { %141 = vsyncpa [#allocation7], 1 }
  0x2c   :  { %142 = vsyncpa [#allocation5], 1 }

</bundles_post_ra>
